<compile_context>
chip_gen: v6e
topology: v6e:2x2x1
jax: 0.10.0
libtpu: 0.0.40
codegen_flags: <defaults>
</compile_context>

<pallas_src>
import jax
import jax.numpy as jnp
from jax.experimental import pallas as pl
from jax.experimental.pallas import tpu as pltpu

EPS = 1e-5


def _make_resblock_kernel(N, H, W, C):
    NC = N * C
    L = H * W
    inv_cnt = 1.0 / float(N * H * W)

    # Per-tap lane shifts (shared by both convs).  For output lane i we need
    # the input at lane i + dy*W + dx; pltpu.roll(x, s)[i] = x[(i - s) mod L],
    # so s = -(dy*W + dx) mod L.  Out-of-bounds taps are zeroed by the masks.
    shifts = []
    for ky in range(3):
        dy = ky - 1
        for kx in range(3):
            dx = kx - 1
            shifts.append((-(dy * W + dx)) % L)

    def kernel(x_ref, w_ref, p_ref, m_ref, o_ref):
        x = x_ref[...]                                  # (NC, L) f32

        # Packed BN params (per activation row) + N-group fold matrix.
        g1 = p_ref[:, 0:1]                              # (NC, 1)
        b1 = p_ref[:, 1:2]
        g2 = p_ref[:, 2:3]
        b2 = p_ref[:, 3:4]
        fold = p_ref[:, 4:4 + NC]                       # (NC, NC) = kron(1_N, I_C)

        mask = m_ref[...]                               # (9*NC, L), ones at center tap

        def conv3x3(inp, w_big):
            # "same" 3x3 conv as a single MXU dot: lane-roll each tap, stack
            # taps along the contraction axis, zero the halo with the
            # precomputed masks, contract with the (NC, 9*NC) packed weights.
            pieces = [inp if s == 0 else pltpu.roll(inp, s, axis=1)
                      for s in shifts]
            stacked = jnp.concatenate(pieces, axis=0) * mask      # (9*NC, L)
            return jnp.dot(w_big, stacked,
                           preferred_element_type=jnp.float32)    # (NC, L)

        def batchnorm(y, gamma, beta):
            # Training-mode BN, biased 1/(N*H*W) stats.  The fold matmul sums
            # the N sublane groups per channel and broadcasts the result back
            # to every row; lane reduction finishes the batch statistic.
            # Two-pass variance (no E[x^2]-mean^2 cancellation).
            mean = jnp.sum(jnp.dot(fold, y, preferred_element_type=jnp.float32),
                           axis=1, keepdims=True) * inv_cnt       # (NC, 1)
            d = y - mean
            var = jnp.sum(jnp.dot(fold, d * d,
                                  preferred_element_type=jnp.float32),
                          axis=1, keepdims=True) * inv_cnt        # (NC, 1)
            scale = gamma * jax.lax.rsqrt(var + EPS)              # EUP rsqrt
            return d * scale + beta

        # conv1 -> BN1 -> ReLU   (intermediate never leaves registers/VMEM)
        y = jnp.maximum(batchnorm(conv3x3(x, w_ref[0]), g1, b1), 0.0)

        # conv2 -> BN2 -> +residual -> ReLU
        z = batchnorm(conv3x3(y, w_ref[1]), g2, b2)
        # Re-read x right before the residual add: keeps its live range short
        # once tiles grow (free at this size).
        o_ref[...] = jnp.maximum(z + x_ref[...], 0.0).astype(o_ref.dtype)

    return kernel


def resblock_forward(x_nchw, w1, w2, g1, b1, g2, b2):
    """x_nchw: (N,C,H,W) f32, w*: (C,C,3,3) f32, g*/b*: (C,) f32."""
    N, C, H, W = x_nchw.shape
    NC, L = N * C, H * W
    f32 = jnp.float32

    # NCHW is contiguous as (N*C, H*W): a FREE reshape, no transpose.
    x_rl = x_nchw.reshape(NC, L)

    # (Cout,Cin,3,3) -> (NC, 9*NC): per tap a kron(I_N, w_tap) block, taps
    # stacked along the contraction axis.  Both convs packed into one input.
    eyeN = jnp.eye(N, dtype=f32)

    def pack_w(w):
        blocks = [jnp.kron(eyeN, w[:, :, ky, kx])
                  for ky in range(3) for kx in range(3)]
        return jnp.concatenate(blocks, axis=1)                    # (NC, 9*NC)

    w_big = jnp.stack([pack_w(w1), pack_w(w2)])                   # (2, NC, 9*NC)

    # BN params tiled per image row + the N-group fold matrix, one input.
    fold = jnp.kron(jnp.ones((N, N), f32), jnp.eye(C, dtype=f32))  # (NC, NC)
    params = jnp.concatenate(
        [jnp.tile(g1, N).reshape(NC, 1), jnp.tile(b1, N).reshape(NC, 1),
         jnp.tile(g2, N).reshape(NC, 1), jnp.tile(b2, N).reshape(NC, 1),
         fold], axis=1).astype(f32)                               # (NC, 4+NC)

    # Border masks are shape-only constants: build host-side, pre-broadcast to
    # the tap-stacked row count (ones for the center tap).
    lane = jnp.arange(L)
    w_idx, h_idx = lane % W, lane // W
    rows = []
    for ky in range(3):
        dy = ky - 1
        for kx in range(3):
            dx = kx - 1
            ok = ((w_idx + dx >= 0) & (w_idx + dx < W) &
                  (h_idx + dy >= 0) & (h_idx + dy < H)).astype(f32)  # (L,)
            rows.append(jnp.broadcast_to(ok, (NC, L)))
    masks = jnp.concatenate(rows, axis=0)                         # (9*NC, L)

    def full(shape):
        return pl.BlockSpec(shape, lambda i, _n=len(shape): (0,) * _n)

    out_rl = pl.pallas_call(
        _make_resblock_kernel(N, H, W, C),
        out_shape=jax.ShapeDtypeStruct((NC, L), f32),
        grid_spec=pltpu.PrefetchScalarGridSpec(
            num_scalar_prefetch=0,
            grid=(1,),
            in_specs=[full((NC, L)),
                      full((2, NC, 9 * NC)),
                      full((NC, 4 + NC)),
                      full((9 * NC, L))],
            out_specs=full((NC, L)),
        ),
        compiler_params=pltpu.CompilerParams(
            dimension_semantics=("arbitrary",)),
    )(x_rl, w_big, params, masks)

    return out_rl.reshape(N, C, H, W)   # free reshape back to NCHW


def ref_forward(x, w1, w2, g1, b1, g2, b2):
    """Pure-JAX reference of the torch forward (NCHW, training-mode BN)."""
    def conv(t, w):
        return jax.lax.conv_general_dilated(
            t, w, window_strides=(1, 1), padding=((1, 1), (1, 1)),
            dimension_numbers=("NCHW", "OIHW", "NCHW"),
            precision=jax.lax.Precision.HIGHEST)

    def bn(t, g, b):
        mean = jnp.mean(t, axis=(0, 2, 3), keepdims=True)
        var = jnp.mean((t - mean) ** 2, axis=(0, 2, 3), keepdims=True)
        return ((t - mean) * jax.lax.rsqrt(var + EPS)
                * g.reshape(1, -1, 1, 1) + b.reshape(1, -1, 1, 1))

    y = jax.nn.relu(bn(conv(x, w1), g1, b1))
    z = bn(conv(y, w2), g2, b2)
    return jax.nn.relu(z + x)


if __name__ == "__main__":
    key = jax.random.PRNGKey(0)
    kx, k1, k2, kg1, kb1, kg2, kb2 = jax.random.split(key, 7)

    N, C, H, W = 2, 4, 16, 16
    x = jax.random.normal(kx, (N, C, H, W), jnp.float32)
    w1 = 0.1 * jax.random.normal(k1, (C, C, 3, 3), jnp.float32)
    w2 = 0.1 * jax.random.normal(k2, (C, C, 3, 3), jnp.float32)
    g1 = 1.0 + 0.1 * jax.random.normal(kg1, (C,), jnp.float32)
    b1 = 0.1 * jax.random.normal(kb1, (C,), jnp.float32)
    g2 = 1.0 + 0.1 * jax.random.normal(kg2, (C,), jnp.float32)
    b2 = 0.1 * jax.random.normal(kb2, (C,), jnp.float32)

    out = jax.block_until_ready(resblock_forward(x, w1, w2, g1, b1, g2, b2))
    ref = jax.block_until_ready(ref_forward(x, w1, w2, g1, b1, g2, b2))

    assert out.shape == (N, C, H, W)
    err = float(jnp.max(jnp.abs(out - ref)))
    assert err < 1e-3, f"max abs err {err}"
    print("KERNEL_OK")
</pallas_src>

<mosaic_0001>
module attributes {stable_mosaic.version = 11 : i64} {
  func.func @kernel(%arg0: i32, %arg1: memref<8x256xf32, #tpu.memory_space<vmem>>, %arg2: memref<2x8x72xf32, #tpu.memory_space<vmem>>, %arg3: memref<8x12xf32, #tpu.memory_space<vmem>>, %arg4: memref<72x256xf32, #tpu.memory_space<vmem>>, %arg5: memref<8x256xf32, #tpu.memory_space<vmem>>) attributes {dimension_semantics = [#tpu.dimension_semantics<arbitrary>], iteration_bounds = array<i64: 1>, scalar_prefetch = 0 : i64, scratch_operands = 0 : i64, tpu.core_type = #tpu.core_type<tc>, window_params = [{pipeline_mode = #tpu.pipeline_mode<synchronous>, transform_indices = @transform_0, window_bounds = array<i64: 8, 256>}, {pipeline_mode = #tpu.pipeline_mode<synchronous>, transform_indices = @transform_1, window_bounds = array<i64: 2, 8, 72>}, {pipeline_mode = #tpu.pipeline_mode<synchronous>, transform_indices = @transform_2, window_bounds = array<i64: 8, 12>}, {pipeline_mode = #tpu.pipeline_mode<synchronous>, transform_indices = @transform_3, window_bounds = array<i64: 72, 256>}, {pipeline_mode = #tpu.pipeline_mode<synchronous>, transform_indices = @transform_4, window_bounds = array<i64: 8, 256>}]} {
    %c0 = arith.constant 0 : index
    %c0_0 = arith.constant 0 : index
    %0 = vector.load %arg1[%c0, %c0_0] : memref<8x256xf32, #tpu.memory_space<vmem>>, vector<8x256xf32>
    %c0_1 = arith.constant 0 : index
    %c0_2 = arith.constant 0 : index
    %1 = vector.load %arg3[%c0_1, %c0_2] : memref<8x12xf32, #tpu.memory_space<vmem>>, vector<8x1xf32>
    %c0_3 = arith.constant 0 : index
    %c1 = arith.constant 1 : index
    %2 = vector.load %arg3[%c0_3, %c1] : memref<8x12xf32, #tpu.memory_space<vmem>>, vector<8x1xf32>
    %c0_4 = arith.constant 0 : index
    %c2 = arith.constant 2 : index
    %3 = vector.load %arg3[%c0_4, %c2] : memref<8x12xf32, #tpu.memory_space<vmem>>, vector<8x1xf32>
    %c0_5 = arith.constant 0 : index
    %c3 = arith.constant 3 : index
    %4 = vector.load %arg3[%c0_5, %c3] : memref<8x12xf32, #tpu.memory_space<vmem>>, vector<8x1xf32>
    %c0_6 = arith.constant 0 : index
    %c4 = arith.constant 4 : index
    %5 = vector.load %arg3[%c0_6, %c4] : memref<8x12xf32, #tpu.memory_space<vmem>>, vector<8x8xf32>
    %c0_7 = arith.constant 0 : index
    %c0_8 = arith.constant 0 : index
    %6 = vector.load %arg4[%c0_7, %c0_8] : memref<72x256xf32, #tpu.memory_space<vmem>>, vector<72x256xf32>
    %c0_9 = arith.constant 0 : index
    %c0_10 = arith.constant 0 : index
    %c0_11 = arith.constant 0 : index
    %7 = vector.load %arg2[%c0_9, %c0_10, %c0_11] : memref<2x8x72xf32, #tpu.memory_space<vmem>>, vector<1x8x72xf32>
    %8 = vector.shape_cast %7 : vector<1x8x72xf32> to vector<8x72xf32>
    %c17_i32 = arith.constant 17 : i32
    %9 = tpu.dynamic_rotate %0 by %c17_i32 dim 1 : vector<8x256xf32>, i32 -> vector<8x256xf32>
    %c16_i32 = arith.constant 16 : i32
    %10 = tpu.dynamic_rotate %0 by %c16_i32 dim 1 : vector<8x256xf32>, i32 -> vector<8x256xf32>
    %c15_i32 = arith.constant 15 : i32
    %11 = tpu.dynamic_rotate %0 by %c15_i32 dim 1 : vector<8x256xf32>, i32 -> vector<8x256xf32>
    %c1_i32 = arith.constant 1 : i32
    %12 = tpu.dynamic_rotate %0 by %c1_i32 dim 1 : vector<8x256xf32>, i32 -> vector<8x256xf32>
    %c255_i32 = arith.constant 255 : i32
    %13 = tpu.dynamic_rotate %0 by %c255_i32 dim 1 : vector<8x256xf32>, i32 -> vector<8x256xf32>
    %c241_i32 = arith.constant 241 : i32
    %14 = tpu.dynamic_rotate %0 by %c241_i32 dim 1 : vector<8x256xf32>, i32 -> vector<8x256xf32>
    %c240_i32 = arith.constant 240 : i32
    %15 = tpu.dynamic_rotate %0 by %c240_i32 dim 1 : vector<8x256xf32>, i32 -> vector<8x256xf32>
    %c239_i32 = arith.constant 239 : i32
    %16 = tpu.dynamic_rotate %0 by %c239_i32 dim 1 : vector<8x256xf32>, i32 -> vector<8x256xf32>
    %17 = tpu.concatenate %9, %10, %11, %12, %0, %13, %14, %15, %16 in 0 : vector<8x256xf32>, vector<8x256xf32>, vector<8x256xf32>, vector<8x256xf32>, vector<8x256xf32>, vector<8x256xf32>, vector<8x256xf32>, vector<8x256xf32>, vector<8x256xf32> -> vector<72x256xf32>
    %18 = arith.mulf %17, %6 : vector<72x256xf32>
    %cst = arith.constant dense<0.000000e+00> : vector<8x256xf32>
    %19 = tpu.matmul %8, %18, %cst {dimension_numbers = #tpu.dot_dimension_numbers<[1], [0], [0], [1], [0, 0, 1, 1], [], []>} : vector<8x72xf32>, vector<72x256xf32>, vector<8x256xf32> -> vector<8x256xf32>
    %cst_12 = arith.constant dense<0.000000e+00> : vector<8x256xf32>
    %20 = tpu.matmul %5, %19, %cst_12 {dimension_numbers = #tpu.dot_dimension_numbers<[1], [0], [0], [1], [0, 0, 1, 1], [], []>} : vector<8x8xf32>, vector<8x256xf32>, vector<8x256xf32> -> vector<8x256xf32>
    %cst_13 = arith.constant dense<0.000000e+00> : vector<8xf32>
    %21 = vector.multi_reduction <add>, %20, %cst_13 [1] : vector<8x256xf32> to vector<8xf32>
    %22 = vector.shape_cast %21 : vector<8xf32> to vector<8x1xf32>
    %cst_14 = arith.constant 0.001953125 : f32
    %23 = vector.broadcast %cst_14 : f32 to vector<8x1xf32>
    %24 = arith.mulf %22, %23 : vector<8x1xf32>
    %25 = vector.broadcast %24 : vector<8x1xf32> to vector<8x256xf32>
    %26 = arith.subf %19, %25 : vector<8x256xf32>
    %27 = arith.mulf %26, %26 : vector<8x256xf32>
    %cst_15 = arith.constant dense<0.000000e+00> : vector<8x256xf32>
    %28 = tpu.matmul %5, %27, %cst_15 {dimension_numbers = #tpu.dot_dimension_numbers<[1], [0], [0], [1], [0, 0, 1, 1], [], []>} : vector<8x8xf32>, vector<8x256xf32>, vector<8x256xf32> -> vector<8x256xf32>
    %cst_16 = arith.constant dense<0.000000e+00> : vector<8xf32>
    %29 = vector.multi_reduction <add>, %28, %cst_16 [1] : vector<8x256xf32> to vector<8xf32>
    %30 = vector.shape_cast %29 : vector<8xf32> to vector<8x1xf32>
    %cst_17 = arith.constant 0.001953125 : f32
    %31 = vector.broadcast %cst_17 : f32 to vector<8x1xf32>
    %32 = arith.mulf %30, %31 : vector<8x1xf32>
    %cst_18 = arith.constant 9.99999974E-6 : f32
    %33 = vector.broadcast %cst_18 : f32 to vector<8x1xf32>
    %34 = arith.addf %32, %33 : vector<8x1xf32>
    %35 = math.rsqrt %34 : vector<8x1xf32>
    %36 = arith.mulf %1, %35 : vector<8x1xf32>
    %37 = vector.broadcast %36 : vector<8x1xf32> to vector<8x256xf32>
    %38 = arith.mulf %26, %37 : vector<8x256xf32>
    %39 = vector.broadcast %2 : vector<8x1xf32> to vector<8x256xf32>
    %40 = arith.addf %38, %39 : vector<8x256xf32>
    %cst_19 = arith.constant 0.000000e+00 : f32
    %41 = vector.broadcast %cst_19 : f32 to vector<8x256xf32>
    %42 = arith.maximumf %40, %41 : vector<8x256xf32>
    %c1_20 = arith.constant 1 : index
    %c0_21 = arith.constant 0 : index
    %c0_22 = arith.constant 0 : index
    %43 = vector.load %arg2[%c1_20, %c0_21, %c0_22] : memref<2x8x72xf32, #tpu.memory_space<vmem>>, vector<1x8x72xf32>
    %44 = vector.shape_cast %43 : vector<1x8x72xf32> to vector<8x72xf32>
    %c17_i32_23 = arith.constant 17 : i32
    %45 = tpu.dynamic_rotate %42 by %c17_i32_23 dim 1 : vector<8x256xf32>, i32 -> vector<8x256xf32>
    %c16_i32_24 = arith.constant 16 : i32
    %46 = tpu.dynamic_rotate %42 by %c16_i32_24 dim 1 : vector<8x256xf32>, i32 -> vector<8x256xf32>
    %c15_i32_25 = arith.constant 15 : i32
    %47 = tpu.dynamic_rotate %42 by %c15_i32_25 dim 1 : vector<8x256xf32>, i32 -> vector<8x256xf32>
    %c1_i32_26 = arith.constant 1 : i32
    %48 = tpu.dynamic_rotate %42 by %c1_i32_26 dim 1 : vector<8x256xf32>, i32 -> vector<8x256xf32>
    %c255_i32_27 = arith.constant 255 : i32
    %49 = tpu.dynamic_rotate %42 by %c255_i32_27 dim 1 : vector<8x256xf32>, i32 -> vector<8x256xf32>
    %c241_i32_28 = arith.constant 241 : i32
    %50 = tpu.dynamic_rotate %42 by %c241_i32_28 dim 1 : vector<8x256xf32>, i32 -> vector<8x256xf32>
    %c240_i32_29 = arith.constant 240 : i32
    %51 = tpu.dynamic_rotate %42 by %c240_i32_29 dim 1 : vector<8x256xf32>, i32 -> vector<8x256xf32>
    %c239_i32_30 = arith.constant 239 : i32
    %52 = tpu.dynamic_rotate %42 by %c239_i32_30 dim 1 : vector<8x256xf32>, i32 -> vector<8x256xf32>
    %53 = tpu.concatenate %45, %46, %47, %48, %42, %49, %50, %51, %52 in 0 : vector<8x256xf32>, vector<8x256xf32>, vector<8x256xf32>, vector<8x256xf32>, vector<8x256xf32>, vector<8x256xf32>, vector<8x256xf32>, vector<8x256xf32>, vector<8x256xf32> -> vector<72x256xf32>
    %54 = arith.mulf %53, %6 : vector<72x256xf32>
    %cst_31 = arith.constant dense<0.000000e+00> : vector<8x256xf32>
    %55 = tpu.matmul %44, %54, %cst_31 {dimension_numbers = #tpu.dot_dimension_numbers<[1], [0], [0], [1], [0, 0, 1, 1], [], []>} : vector<8x72xf32>, vector<72x256xf32>, vector<8x256xf32> -> vector<8x256xf32>
    %cst_32 = arith.constant dense<0.000000e+00> : vector<8x256xf32>
    %56 = tpu.matmul %5, %55, %cst_32 {dimension_numbers = #tpu.dot_dimension_numbers<[1], [0], [0], [1], [0, 0, 1, 1], [], []>} : vector<8x8xf32>, vector<8x256xf32>, vector<8x256xf32> -> vector<8x256xf32>
    %cst_33 = arith.constant dense<0.000000e+00> : vector<8xf32>
    %57 = vector.multi_reduction <add>, %56, %cst_33 [1] : vector<8x256xf32> to vector<8xf32>
    %58 = vector.shape_cast %57 : vector<8xf32> to vector<8x1xf32>
    %cst_34 = arith.constant 0.001953125 : f32
    %59 = vector.broadcast %cst_34 : f32 to vector<8x1xf32>
    %60 = arith.mulf %58, %59 : vector<8x1xf32>
    %61 = vector.broadcast %60 : vector<8x1xf32> to vector<8x256xf32>
    %62 = arith.subf %55, %61 : vector<8x256xf32>
    %63 = arith.mulf %62, %62 : vector<8x256xf32>
    %cst_35 = arith.constant dense<0.000000e+00> : vector<8x256xf32>
    %64 = tpu.matmul %5, %63, %cst_35 {dimension_numbers = #tpu.dot_dimension_numbers<[1], [0], [0], [1], [0, 0, 1, 1], [], []>} : vector<8x8xf32>, vector<8x256xf32>, vector<8x256xf32> -> vector<8x256xf32>
    %cst_36 = arith.constant dense<0.000000e+00> : vector<8xf32>
    %65 = vector.multi_reduction <add>, %64, %cst_36 [1] : vector<8x256xf32> to vector<8xf32>
    %66 = vector.shape_cast %65 : vector<8xf32> to vector<8x1xf32>
    %cst_37 = arith.constant 0.001953125 : f32
    %67 = vector.broadcast %cst_37 : f32 to vector<8x1xf32>
    %68 = arith.mulf %66, %67 : vector<8x1xf32>
    %cst_38 = arith.constant 9.99999974E-6 : f32
    %69 = vector.broadcast %cst_38 : f32 to vector<8x1xf32>
    %70 = arith.addf %68, %69 : vector<8x1xf32>
    %71 = math.rsqrt %70 : vector<8x1xf32>
    %72 = arith.mulf %3, %71 : vector<8x1xf32>
    %73 = vector.broadcast %72 : vector<8x1xf32> to vector<8x256xf32>
    %74 = arith.mulf %62, %73 : vector<8x256xf32>
    %75 = vector.broadcast %4 : vector<8x1xf32> to vector<8x256xf32>
    %76 = arith.addf %74, %75 : vector<8x256xf32>
    %c0_39 = arith.constant 0 : index
    %c0_40 = arith.constant 0 : index
    %77 = vector.load %arg1[%c0_39, %c0_40] : memref<8x256xf32, #tpu.memory_space<vmem>>, vector<8x256xf32>
    %78 = arith.addf %76, %77 : vector<8x256xf32>
    %cst_41 = arith.constant 0.000000e+00 : f32
    %79 = vector.broadcast %cst_41 : f32 to vector<8x256xf32>
    %80 = arith.maximumf %78, %79 : vector<8x256xf32>
    %c0_42 = arith.constant 0 : index
    %c0_43 = arith.constant 0 : index
    %81 = vector.load %arg5[%c0_42, %c0_43] : memref<8x256xf32, #tpu.memory_space<vmem>>, vector<8x256xf32>
    tpu.vector_store %arg5[%c0_42, %c0_43], %80 {strides = array<i32>} : memref<8x256xf32, #tpu.memory_space<vmem>>, vector<8x256xf32>,
    return
  }
  func.func @transform_0(%arg0: i32) -> (i32, i32) {
    %c0_i32 = arith.constant 0 : i32
    %c0_i32_0 = arith.constant 0 : i32
    %c0_i32_1 = arith.constant 0 : i32
    return %c0_i32, %c0_i32_0 : i32, i32
  }
  func.func @transform_1(%arg0: i32) -> (i32, i32, i32) {
    %c0_i32 = arith.constant 0 : i32
    %c0_i32_0 = arith.constant 0 : i32
    %c0_i32_1 = arith.constant 0 : i32
    %c0_i32_2 = arith.constant 0 : i32
    return %c0_i32, %c0_i32_0, %c0_i32_1 : i32, i32, i32
  }
  func.func @transform_2(%arg0: i32) -> (i32, i32) {
    %c0_i32 = arith.constant 0 : i32
    %c0_i32_0 = arith.constant 0 : i32
    %c0_i32_1 = arith.constant 0 : i32
    return %c0_i32, %c0_i32_0 : i32, i32
  }
  func.func @transform_3(%arg0: i32) -> (i32, i32) {
    %c0_i32 = arith.constant 0 : i32
    %c0_i32_0 = arith.constant 0 : i32
    %c0_i32_1 = arith.constant 0 : i32
    return %c0_i32, %c0_i32_0 : i32, i32
  }
  func.func @transform_4(%arg0: i32) -> (i32, i32) {
    %c0_i32 = arith.constant 0 : i32
    %c0_i32_0 = arith.constant 0 : i32
    %c0_i32_1 = arith.constant 0 : i32
    return %c0_i32, %c0_i32_0 : i32, i32
  }
}

</mosaic_0001>

<bundles_post_ra>
// kernel: tpu_custom_call.1
= control target key start
LH: loop header
LB: loop body
LE: loop exit
PB: predicated region body
PF: predicated region fallthrough
CT: control target
= control target key end

     0   :  { %9 = vsyncpa [#allocation3], 0  ;;  %s1190_s0 = inlined_call_operand.hbm [shape: f32[8,256], index: 0, kind: input, shape index: {}]   ;;  %s1191_s1 = inlined_call_operand.hbm [shape: f32[2,8,72], index: 1, kind: input, shape index: {}]   ;;  %s1192_s2 = inlined_call_operand.hbm [shape: f32[8,12], index: 2, kind: input, shape index: {}]   ;;  %s1193_s3 = inlined_call_operand.hbm [shape: f32[72,256], index: 3, kind: input, shape index: {}]   ;;  %s1194_s4 = inlined_call_operand.hbm [shape: f32[8,256], index: 4, kind: output, shape index: {}]  }
   0x1   :  { %10 = vsyncpa [#allocation6], 0 }
   0x2   :  { %11 = vsyncpa [#allocation9], 0 }
   0x3   :  { %12 = vsyncpa [#allocation4], 0  ;;  %s900_s15 = smov [#allocation5]  }
   0x4   :  { %s28_s16 = sshll.u32 %s900_s15, 4  ;;  %s29_s16 = int_to_ptr.vmem [resolvable:$true] %s28_s16 }
   0x5   :  { %s800_s17 = scalar_lea.vmem %s29_s16, 256  ;;  %p805_p1 = scmp.lt.s32.totalorder %s29_s16, %s29_s16 }
   0x6   :  { %p801_p0 = scmp.ne.s32.totalorder %s29_s16, %s800_s17  ;;  %p806_p2 = scmp.lt.s32.totalorder %s800_s17, %s800_s17 }
   0x8   :  { %p807_p3 = por %p806_p2, %p805_p1 }
   0xa   :  { %p808_p4 = pnand %p807_p3, %p801_p0 }
   0xc   :  { %811 = shalt.err (!%p808_p4)
}
   0xd   :  { %s901_s18 = smov 128   ;;  %s902_s19 = smov 8  }
   0xe   :  { %34 = dma.hbm_to_vmem [thread:$0]  %s1191_s1, 256, %s29_s16, [#allocation6], %s901_s18, %s901_s18, %s902_s19  }
   0xf   :  { %s903_s22 = smov [#allocation2]   ;;  %s904_s24 = smov [#allocation7]  }
  0x10   :  { %s19_s23 = sshll.u32 %s903_s22, 4  ;;  %s41_s25 = sshll.u32 %s904_s24, 4  ;;  %s20_s23 = int_to_ptr.vmem [resolvable:$true] %s19_s23  ;;  %s42_s25 = int_to_ptr.vmem [resolvable:$true] %s41_s25 }
  0x11   :  { %s820_s26 = scalar_lea.vmem %s20_s23, 256  ;;  %p825_p6 = scmp.lt.s32.totalorder %s20_s23, %s20_s23 }
  0x12   :  { %p821_p5 = scmp.ne.s32.totalorder %s20_s23, %s820_s26  ;;  %p826_p7 = scmp.lt.s32.totalorder %s820_s26, %s820_s26 }
  0x14   :  { %p827_p8 = por %p826_p7, %p825_p6 }
  0x16   :  { %p828_p9 = pnand %p827_p8, %p821_p5 }
  0x18   :  { %831 = shalt.err (!%p828_p9)
}
  0x19   :  { %22 = dma.hbm_to_vmem [thread:$0]  %s1190_s0, 256, %s20_s23, [#allocation3]  }
  0x1a   :  { %s840_s29 = scalar_lea.vmem %s42_s25, 128  ;;  %p845_p11 = scmp.lt.s32.totalorder %s42_s25, %s42_s25 }
  0x1b   :  { %p841_p10 = scmp.ne.s32.totalorder %s42_s25, %s840_s29  ;;  %p846_p12 = scmp.lt.s32.totalorder %s840_s29, %s840_s29 }
  0x1d   :  { %p847_p13 = por %p846_p12, %p845_p11 }
  0x1f   :  { %p848_p0 = pnand %p847_p13, %p841_p10 }
  0x21   :  { %851 = shalt.err (!%p848_p0)
}
  0x22   :  { %44 = dma.hbm_to_vmem [thread:$0]  %s1192_s2, 128, %s42_s25, [#allocation6]  }
  0x23   :  { %s905_s5 = smov [#allocation8]  }
  0x24   :  { %s50_s6 = sshll.u32 %s905_s5, 4  ;;  %s51_s6 = int_to_ptr.vmem [resolvable:$true] %s50_s6 }
  0x25   :  { %s860_s7 = scalar_lea.vmem %s51_s6, 2304  ;;  %p865_p2 = scmp.lt.s32.totalorder %s51_s6, %s51_s6 }
  0x26   :  { %p861_p1 = scmp.ne.s32.totalorder %s51_s6, %s860_s7  ;;  %p866_p3 = scmp.lt.s32.totalorder %s860_s7, %s860_s7 }
  0x28   :  { %p867_p4 = por %p866_p3, %p865_p2 }
  0x2a   :  { %p868_p5 = pnand %p867_p4, %p861_p1 }
  0x2c   :  { %871 = shalt.err (!%p868_p5)
}
  0x2d   :  { %s906_s0 = smov 256   ;;  %s907_s8 = smov 16  }
  0x2e   :  { %56 = dma.hbm_to_vmem [thread:$0]  %s1193_s3, 2304, %s51_s6, [#allocation9], %s906_s0, %s906_s0, %s907_s8  }
  0x2f   :  { %892 = dma.done.wait [#allocation3], 256  }
  0x30   :  { %893 = vsyncadd [#allocation3], 4294967040 }
  0x31   :  { %894 = dma.done.wait [#allocation6], 384  }
  0x32   :  { %895 = vsyncadd [#allocation6], 4294966912 }
  0x33   :  { %896 = dma.done.wait [#allocation9], 2304  }
  0x34   :  { %897 = vsyncadd [#allocation9], 4294964992  ;;  %v960_v0 = vld [vmem:[#allocation2] sm:$0xff]  ;;  %s908_s2 = smov 112   ;;  %s909_s11 = smov 111   ;;  %v966_v1 = vld [vmem:[#allocation2 + $0x8] sm:$0xff]  ;;  %v95_v4 = vlaneseq }
  0x35   :  { %135 = vrot.lane.b32.xlu1 %v960_v0, %s908_s2  ;;  %142 = vrot.lane.b32.xlu0 %v960_v0, %s909_s11  ;;  %s910_s3 = smov 113   ;;  %s911_s12 = smov 127   ;;  %v913_v2 = vmov 0.0   ;;  %v998_v3 = vld [vmem:[#allocation7] sm:$0xff]  ;;  %v1005_v8 = vld [vmem:[#allocation8 + $0x88] sm:$0xff]  ;;  %v1007_v9 = vld [vmem:[#allocation8 + $0x80] sm:$0xff] }
  0x36   :  { %s912_s13 = smov 1   ;;  %235 = vmatprep.mubr.f32.mxu0 %v913_v2  ;;  %312 = vmatprep.mubr.f32.mxu1 %v913_v2  ;;  %s914_s14 = smov 15   ;;  %v1001_v5 = vand.u32 127, %v95_v4  ;;  %v1009_v12 = vld [vmem:[#allocation8 + $0x78] sm:$0xff]  ;;  %v1017_v16 = vld [vmem:[#allocation8 + $0x70] sm:$0xff]  ;;  %v1024_v20 = vld [vmem:[#allocation8 + $0x60] sm:$0xff] }
  0x37   :  { %s915_s15 = smov 17   ;;  %s916_s16 = smov 124   ;;  %v1026_v21 = vld [vmem:[#allocation8 + $0x68] sm:$0xff]  ;;  %v1037_v30 = vld [vmem:[#allocation8 + $0x50] sm:$0xff]  ;;  %v1039_v31 = vld [vmem:[#allocation8 + $0x58] sm:$0xff]  ;;  %vm167_vm8 = vcmask 588800  }
  0x38   :  { %vm139_vm0 = vcmp.lt.s32.totalorder %v1001_v5, 112  ;;  %vm146_vm1 = vcmp.lt.s32.totalorder %v1001_v5, 111  ;;  %vm132_vm2 = vcmp.lt.s32.totalorder %v1001_v5, 113  ;;  %vm125_vm3 = vcmp.lt.s32.totalorder %v1001_v5, 127  ;;  %v1041_v32 = vld [vmem:[#allocation8 + $0x48] sm:$0xff]  ;;  %v1043_v35 = vld [vmem:[#allocation8 + $0x40] sm:$0xff] }
  0x39   :  { %137 = vrot.lane.b32.xlu1 %v966_v1, %s908_s2  ;;  %144 = vrot.lane.b32.xlu0 %v966_v1, %s909_s11  ;;  %vm118_vm4 = vcmp.lt.s32.totalorder %v1001_v5, 1  ;;  %v158_v40 = vmul.f32 %v1041_v32, %v966_v1  ;;  %v1054_v41 = vld [vmem:[#allocation8 + $0x30] sm:$0xff]  ;;  %v1056_v42 = vld [vmem:[#allocation8 + $0x38] sm:$0xff]  ;;  %v157_v43 = vmul.f32 %v1043_v35, %v960_v0  ;;  %vm111_vm5 = vcmp.lt.s32.totalorder %v1001_v5, 15  ;;  %v1067_v50 = vld [vmem:[#allocation8 + $0x20] sm:$0xff]  ;;  %s921_s17 = smov [#allocation10]  }
  0x3a   :  { %v1069_v51 = vld [vmem:[#allocation8 + $0x28] sm:$0xff]  ;;  %vm104_vm6 = vcmp.lt.s32.totalorder %v1001_v5, 16  ;;  %v1078_v58 = vld [vmem:[#allocation8 + $0x10] sm:$0xff]  ;;  %v1080_v59 = vld [vmem:[#allocation8 + $0x18] sm:$0xff]  ;;  %vm97_vm7 = vcmp.lt.s32.totalorder %v1001_v5, 17  ;;  %vm245_vm9 = vcmask 64512  }
  0x3b   :  { %s744_s18 = sshll.u32 %s921_s17, 4  ;;  %s745_s18 = int_to_ptr.vmem [resolvable:$true] %s744_s18 }
  0x3c   :  { %s872_s19 = scalar_lea.vmem %s745_s18, 256  ;;  %p877_p7 = scmp.lt.s32.totalorder %s745_s18, %s745_s18 }
  0x3d   :  { %130 = vrot.lane.b32.xlu1 %v966_v1, %s910_s3  ;;  %128 = vrot.lane.b32.xlu0 %v960_v0, %s910_s3  ;;  %p873_p6 = scmp.ne.s32.totalorder %s745_s18, %s872_s19  ;;  %p878_p8 = scmp.lt.s32.totalorder %s872_s19, %s872_s19 }
  0x3f   :  { %p879_p9 = por %p878_p8, %p877_p7 }
  0x41   :  { %123 = vrot.lane.b32.xlu1 %v966_v1, %s911_s12  ;;  %121 = vrot.lane.b32.xlu0 %v960_v0, %s911_s12  ;;  %p880_p10 = pnand %p879_p9, %p873_p6 }
  0x45   :  { %116 = vrot.lane.b32.xlu1 %v966_v1, %s912_s13  ;;  %114 = vrot.lane.b32.xlu0 %v960_v0, %s912_s13 }
  0x49   :  { %109 = vrot.lane.b32.xlu1 %v966_v1, %s914_s14  ;;  %107 = vrot.lane.b32.xlu0 %v960_v0, %s914_s14 }
  0x4d   :  { %102 = vrot.lane.b32.xlu1 %v966_v1, %s907_s8  ;;  %100 = vrot.lane.b32.xlu0 %v960_v0, %s907_s8 }
  0x51   :  { %93 = vrot.lane.b32.xlu1 %v966_v1, %s915_s15  ;;  %91 = vrot.lane.b32.xlu0 %v960_v0, %s915_s15 }
  0x55   :  { %243 = vrot.lane.b32.xlu0 %v998_v3, %s916_s16 }
  0xa7   :  { %v136_v6 = vpop.permute.xlu1 %135  ;;  %v143_v7 = vpop.permute.xlu0 %142 }
  0xab   :  { %v138_v10 = vpop.permute.xlu1 %137  ;;  %v145_v11 = vpop.permute.xlu0 %144 }
  0xac   :  { %v141_v13 = vsel %vm139_vm0, %v138_v10, %v136_v6  ;;  %v147_v14 = vsel %vm146_vm1, %v143_v7, %v145_v11  ;;  %v148_v15 = vsel %vm146_vm1, %v145_v11, %v143_v7  ;;  %v140_v17 = vsel %vm139_vm0, %v136_v6, %v138_v10  ;;  %v1089_v7 = vld [vmem:[#allocation8] sm:$0xff]  ;;  %v1091_v10 = vld [vmem:[#allocation8 + $0x8] sm:$0xff] }
  0xad   :  { %v166_v18 = vmul.f32 %v148_v15, %v1005_v8  ;;  %v165_v19 = vmul.f32 %v147_v14, %v1007_v9  ;;  %v164_v22 = vmul.f32 %v141_v13, %v1009_v12  ;;  %v163_v25 = vmul.f32 %v140_v17, %v1017_v16 }
  0xaf   :  { %v131_v23 = vpop.permute.xlu1 %130  ;;  %185 = vmatprep.subr.mxu0 %v166_v18  ;;  %v129_v24 = vpop.permute.xlu0 %128 }
  0xb0   :  { %v133_v26 = vsel %vm132_vm2, %v129_v24, %v131_v23  ;;  %v134_v27 = vsel %vm132_vm2, %v131_v23, %v129_v24  ;;  %186 = vmatpush1.msra.mxu0 %v165_v19  ;;  %v90_v19 = vld [vmem:[#allocation5] sm:$0xff] }
  0xb1   :  { %v161_v28 = vmul.f32 %v133_v26, %v1024_v20  ;;  %v162_v29 = vmul.f32 %v134_v27, %v1026_v21  ;;  %187 = vmatprep.subr.mxu0 %v164_v22 }
  0xb2   :  { %188 = vmatpush1.msra.mxu0 %v163_v25 }
  0xb3   :  { %v124_v33 = vpop.permute.xlu1 %123  ;;  %189 = vmatprep.subr.mxu0 %v162_v29  ;;  %v122_v34 = vpop.permute.xlu0 %121 }
  0xb4   :  { %v126_v36 = vsel %vm125_vm3, %v122_v34, %v124_v33  ;;  %v127_v37 = vsel %vm125_vm3, %v124_v33, %v122_v34  ;;  %190 = vmatpush1.msra.mxu0 %v161_v28 }
  0xb5   :  { %v159_v38 = vmul.f32 %v126_v36, %v1037_v30  ;;  %v160_v39 = vmul.f32 %v127_v37, %v1039_v31 }
  0xb7   :  { %v117_v44 = vpop.permute.xlu1 %116  ;;  %191 = vmatprep.subr.mxu0 %v160_v39  ;;  %v115_v45 = vpop.permute.xlu0 %114 }
  0xb8   :  { %v119_v46 = vsel %vm118_vm4, %v115_v45, %v117_v44  ;;  %v120_v47 = vsel %vm118_vm4, %v117_v44, %v115_v45  ;;  %192 = vmatpush1.msra.mxu0 %v159_v38  ;;  %v918_v44 = vmov 1  }
  0xb9   :  { %v155_v48 = vmul.f32 %v120_v47, %v1054_v41  ;;  %v156_v49 = vmul.f32 %v119_v46, %v1056_v42  ;;  %193 = vmatprep.subr.mxu0 %v158_v40  ;;  %784 = vset.pattern.permute.xlu1 %v918_v44 }
  0xba   :  { %194 = vmatpush1.msra.mxu0 %v157_v43  ;;  %v917_v43 = vmov 0  }
  0xbb   :  { %v110_v52 = vpop.permute.xlu1 %109  ;;  %v108_v53 = vpop.permute.xlu0 %107  ;;  %195 = vmatprep.subr.mxu0 %v156_v49  ;;  %783 = vset.pattern.permute.xlu0 %v917_v43 }
  0xbc   :  { %v112_v54 = vsel %vm111_vm5, %v108_v53, %v110_v52  ;;  %v113_v55 = vsel %vm111_vm5, %v110_v52, %v108_v53  ;;  %196 = vmatpush1.msra.mxu0 %v155_v48 }
  0xbd   :  { %v153_v56 = vmul.f32 %v113_v55, %v1067_v50  ;;  %v154_v57 = vmul.f32 %v112_v54, %v1069_v51 }
  0xbf   :  { %v103_v60 = vpop.permute.xlu1 %102  ;;  %v101_v61 = vpop.permute.xlu0 %100  ;;  %197 = vmatprep.subr.mxu0 %v154_v57 }
  0xc0   :  { %v105_v62 = vsel %vm104_vm6, %v101_v61, %v103_v60  ;;  %v106_v63 = vsel %vm104_vm6, %v103_v60, %v101_v61  ;;  %198 = vmatpush1.msra.mxu0 %v153_v56 }
  0xc1   :  { %v151_v4 = vmul.f32 %v106_v63, %v1078_v58  ;;  %v152_v6 = vmul.f32 %v105_v62, %v1080_v59 }
  0xc3   :  { %v94_v11 = vpop.permute.xlu1 %93  ;;  %v92_v13 = vpop.permute.xlu0 %91  ;;  %199 = vmatprep.subr.mxu0 %v152_v6 }
  0xc4   :  { %v98_v14 = vsel %vm97_vm7, %v92_v13, %v94_v11  ;;  %v99_v15 = vsel %vm97_vm7, %v94_v11, %v92_v13  ;;  %200 = vmatpush1.msra.mxu0 %v151_v4 }
  0xc5   :  { %v149_v17 = vmul.f32 %v99_v15, %v1089_v7  ;;  %v150_v18 = vmul.f32 %v98_v14, %v1091_v10 }
  0xc7   :  { %201 = vmatprep.subr.mxu0 %v150_v18  ;;  %v1101_v24 = vpop.permute.xlu0 %243 }
  0xc8   :  { %202 = vmatpush1.msra.mxu0 %v149_v17 }
  0xc9   :  { %755 = vmatmul.mubr.msk.f32.vlgmr.msra.gmra.mxu0 %vm167_vm8, %v90_v19 }
  0xca   :  { %626 = vmatprep.mubr.f32.mxu0 %v913_v2 }
 0x189   :  { %v237_v22 = vpop.f32.mrf.mxu0 }
 0x18b   :  { %v239_v23 = vpop.f32.mrf.mxu0 }
 0x18c   :  { %278 = vmatprep.subr.mxu1 %v239_v23 }
 0x18d   :  { %279 = vmatpush1.msra.mxu1 %v237_v22 }
 0x18e   :  { %756 = vmatmul.mubr.msk.f32.vlgmr.msra.gmra.mxu1 %vm245_vm9, %v1101_v24 }
 0x18f   :  { %391 = vmatprep.mubr.f32.mxu1 %v913_v2 }
 0x24e   :  { %v314_v25 = vpop.f32.mrf.mxu1 }
 0x250   :  { %v316_v26 = vpop.f32.mrf.mxu1 }
 0x251   :  { %v319_v27 = vadd.f32 %v316_v26, %v314_v25 }
 0x253   :  { %320 = vadd.xlane.f32.xlu1 %v319_v27 }
 0x264   :  { %413 = vperm.xlu1 %784, %v998_v3  }
 0x2dc   :  { %v321_v28 = vpop.xlane.xlu1 %320 }
 0x2dd   :  { %v322_v29 = vmul.f32 0.001953125, %v321_v28 }
 0x2df   :  { %v323_v33 = vsub.f32 %v237_v22, %v322_v29  ;;  %v324_v34 = vsub.f32 %v239_v23, %v322_v29 }
 0x2e0   :  { %v414_v53 = vpop.permute.xlu1 %413 }
 0x2e1   :  { %v325_v36 = vmul.f32 %v323_v33, %v323_v33  ;;  %v326_v37 = vmul.f32 %v324_v34, %v324_v34 }
 0x2e3   :  { %357 = vmatprep.subr.mxu1 %v326_v37 }
 0x2e4   :  { %358 = vmatpush1.msra.mxu1 %v325_v36 }
 0x2e5   :  { %757 = vmatmul.mubr.msk.f32.vlgmr.msra.gmra.mxu1 %vm245_vm9, %v1101_v24 }
 0x2e6   :  { %555 = vmatprep.mubr.f32.mxu1 %v913_v2 }
 0x3a5   :  { %v393_v38 = vpop.f32.mrf.mxu1 }
 0x3a7   :  { %v395_v39 = vpop.f32.mrf.mxu1 }
 0x3a8   :  { %v398_v40 = vadd.f32 %v395_v39, %v393_v38 }
 0x3aa   :  { %399 = vadd.xlane.f32.xlu0 %v398_v40 }
 0x433   :  { %v400_v45 = vpop.xlane.xlu0 %399 }
 0x434   :  { %v401_v46 = vmul.f32 0.001953125, %v400_v45 }
 0x436   :  { %v402_v47 = vadd.f32 1e-05, %v401_v46 }
 0x438   :  { %788 = vrsqrt.f32 %v402_v47 }
 0x445   :  { %v789_v48 = vpop.eup %788 }
 0x446   :  { %v404_v49 = vmul.f32 %v789_v48, %v998_v3 }
 0x448   :  { %407 = vperm.xlu0 %783, %v404_v49  }
 0x4c3   :  { %v408_v52 = vpop.permute.xlu0 %407 }
 0x4c4   :  { %v410_v54 = vmul.f32 %v408_v52, %v323_v33  ;;  %v411_v55 = vmul.f32 %v408_v52, %v324_v34 }
 0x4c6   :  { %v416_v56 = vadd.f32 %v414_v53, %v410_v54  ;;  %v417_v57 = vadd.f32 %v414_v53, %v411_v55 }
 0x4c8   :  { %v418_v60 = vmax.f32 %v416_v56, 0.0  ;;  %v419_v61 = vmax.f32 %v417_v57, 0.0  ;;  %v421_v56 = vld [vmem:[#allocation5 + $0x8] sm:$0xff] }
 0x4ca   :  { %448 = vrot.lane.b32.xlu0 %v419_v61, %s911_s12  ;;  %464 = vrot.lane.b32.xlu1 %v418_v60, %s909_s11  ;;  %v478_v40 = vmul.f32 %v418_v60, %v1043_v35 }
 0x4ce   :  { %442 = vrot.lane.b32.xlu0 %v419_v61, %s912_s13  ;;  %466 = vrot.lane.b32.xlu1 %v419_v61, %s909_s11 }
 0x4d2   :  { %436 = vrot.lane.b32.xlu0 %v419_v61, %s914_s14  ;;  %458 = vrot.lane.b32.xlu1 %v418_v60, %s908_s2 }
 0x4d6   :  { %430 = vrot.lane.b32.xlu0 %v419_v61, %s907_s8  ;;  %460 = vrot.lane.b32.xlu1 %v419_v61, %s908_s2 }
 0x4da   :  { %424 = vrot.lane.b32.xlu0 %v419_v61, %s915_s15  ;;  %452 = vrot.lane.b32.xlu1 %v418_v60, %s910_s3 }
 0x4de   :  { %454 = vrot.lane.b32.xlu1 %v419_v61, %s910_s3 }
 0x4e2   :  { %446 = vrot.lane.b32.xlu1 %v418_v60, %s911_s12 }
 0x4e6   :  { %440 = vrot.lane.b32.xlu1 %v418_v60, %s912_s13 }
 0x4ea   :  { %434 = vrot.lane.b32.xlu1 %v418_v60, %s914_s14 }
 0x4ee   :  { %428 = vrot.lane.b32.xlu1 %v418_v60, %s907_s8 }
 0x4f2   :  { %422 = vrot.lane.b32.xlu1 %v418_v60, %s915_s15 }
 0x53c   :  { %v465_v62 = vpop.permute.xlu1 %464  ;;  %v449_v23 = vpop.permute.xlu0 %448 }
 0x540   :  { %v467_v63 = vpop.permute.xlu1 %466  ;;  %v443_v27 = vpop.permute.xlu0 %442 }
 0x541   :  { %v468_v4 = vsel %vm146_vm1, %v465_v62, %v467_v63  ;;  %v469_v6 = vsel %vm146_vm1, %v467_v63, %v465_v62 }
 0x542   :  { %v486_v11 = vmul.f32 %v468_v4, %v1007_v9  ;;  %v487_v13 = vmul.f32 %v469_v6, %v1005_v8 }
 0x544   :  { %505 = vmatprep.subr.mxu1 %v487_v13  ;;  %v459_v14 = vpop.permute.xlu1 %458  ;;  %v437_v37 = vpop.permute.xlu0 %436 }
 0x545   :  { %506 = vmatpush1.msra.mxu1 %v486_v11 }
 0x548   :  { %v461_v15 = vpop.permute.xlu1 %460  ;;  %v431_v45 = vpop.permute.xlu0 %430 }
 0x549   :  { %v462_v17 = vsel %vm139_vm0, %v459_v14, %v461_v15  ;;  %v463_v18 = vsel %vm139_vm0, %v461_v15, %v459_v14  ;;  %v920_v14 = vmov 3  }
 0x54a   :  { %v484_v19 = vmul.f32 %v462_v17, %v1017_v16  ;;  %v485_v22 = vmul.f32 %v463_v18, %v1009_v12  ;;  %786 = vset.pattern.permute.xlu1 %v920_v14 }
 0x54c   :  { %507 = vmatprep.subr.mxu1 %v485_v22  ;;  %v453_v25 = vpop.permute.xlu1 %452  ;;  %v425_v52 = vpop.permute.xlu0 %424 }
 0x54d   :  { %508 = vmatpush1.msra.mxu1 %v484_v19 }
 0x550   :  { %v455_v9 = vpop.permute.xlu1 %454 }
 0x551   :  { %v456_v8 = vsel %vm132_vm2, %v453_v25, %v455_v9  ;;  %v457_v26 = vsel %vm132_vm2, %v455_v9, %v453_v25 }
 0x552   :  { %v482_v28 = vmul.f32 %v456_v8, %v1024_v20  ;;  %v483_v29 = vmul.f32 %v457_v26, %v1026_v21  ;;  %v479_v20 = vmul.f32 %v419_v61, %v1041_v32 }
 0x554   :  { %509 = vmatprep.subr.mxu1 %v483_v29  ;;  %v447_v16 = vpop.permute.xlu1 %446 }
 0x555   :  { %v450_v12 = vsel %vm125_vm3, %v447_v16, %v449_v23  ;;  %v451_v33 = vsel %vm125_vm3, %v449_v23, %v447_v16  ;;  %510 = vmatpush1.msra.mxu1 %v482_v28 }
 0x556   :  { %v480_v34 = vmul.f32 %v450_v12, %v1037_v30  ;;  %v481_v36 = vmul.f32 %v451_v33, %v1039_v31 }
 0x558   :  { %511 = vmatprep.subr.mxu1 %v481_v36  ;;  %v441_v38 = vpop.permute.xlu1 %440 }
 0x559   :  { %v444_v21 = vsel %vm118_vm4, %v441_v38, %v443_v27  ;;  %v445_v39 = vsel %vm118_vm4, %v443_v27, %v441_v38  ;;  %512 = vmatpush1.msra.mxu1 %v480_v34 }
 0x55a   :  { %v476_v43 = vmul.f32 %v445_v39, %v1054_v41  ;;  %v477_v30 = vmul.f32 %v444_v21, %v1056_v42  ;;  %513 = vmatprep.subr.mxu1 %v479_v20 }
 0x55b   :  { %514 = vmatpush1.msra.mxu1 %v478_v40 }
 0x55c   :  { %v435_v31 = vpop.permute.xlu1 %434  ;;  %515 = vmatprep.subr.mxu1 %v477_v30 }
 0x55d   :  { %v438_v32 = vsel %vm111_vm5, %v435_v31, %v437_v37  ;;  %v439_v44 = vsel %vm111_vm5, %v437_v37, %v435_v31  ;;  %516 = vmatpush1.msra.mxu1 %v476_v43 }
 0x55e   :  { %v474_v46 = vmul.f32 %v439_v44, %v1067_v50  ;;  %v475_v35 = vmul.f32 %v438_v32, %v1069_v51 }
 0x560   :  { %v429_v47 = vpop.permute.xlu1 %428  ;;  %517 = vmatprep.subr.mxu1 %v475_v35 }
 0x561   :  { %v432_v41 = vsel %vm104_vm6, %v429_v47, %v431_v45  ;;  %v433_v42 = vsel %vm104_vm6, %v431_v45, %v429_v47  ;;  %518 = vmatpush1.msra.mxu1 %v474_v46 }
 0x562   :  { %v472_v48 = vmul.f32 %v433_v42, %v1078_v58  ;;  %v473_v49 = vmul.f32 %v432_v41, %v1080_v59 }
 0x564   :  { %v423_v53 = vpop.permute.xlu1 %422  ;;  %519 = vmatprep.subr.mxu1 %v473_v49 }
 0x565   :  { %v426_v50 = vsel %vm97_vm7, %v423_v53, %v425_v52  ;;  %v427_v51 = vsel %vm97_vm7, %v425_v52, %v423_v53  ;;  %520 = vmatpush1.msra.mxu1 %v472_v48 }
 0x566   :  { %v470_v54 = vmul.f32 %v427_v51, %v1089_v7  ;;  %v471_v55 = vmul.f32 %v426_v50, %v1091_v10 }
 0x568   :  { %521 = vmatprep.subr.mxu1 %v471_v55 }
 0x569   :  { %522 = vmatpush1.msra.mxu1 %v470_v54 }
 0x56a   :  { %758 = vmatmul.mubr.msk.f32.vlgmr.msra.gmra.mxu1 %vm167_vm8, %v421_v56 }
 0x62a   :  { %v557_v58 = vpop.f32.mrf.mxu1 }
 0x62c   :  { %v559_v59 = vpop.f32.mrf.mxu1 }
 0x62d   :  { %592 = vmatprep.subr.mxu0 %v559_v59 }
 0x62e   :  { %593 = vmatpush1.msra.mxu0 %v557_v58 }
 0x62f   :  { %759 = vmatmul.mubr.msk.f32.vlgmr.msra.gmra.mxu0 %vm245_vm9, %v1101_v24 }
 0x630   :  { %705 = vmatprep.mubr.f32.mxu0 %v913_v2  ;;  %v919_v2 = vmov 2  }
 0x631   :  { %785 = vset.pattern.permute.xlu0 %v919_v2 }
 0x6ef   :  { %v628_v5 = vpop.f32.mrf.mxu0 }
 0x6f1   :  { %v630_v57 = vpop.f32.mrf.mxu0 }
 0x6f2   :  { %v633_v60 = vadd.f32 %v630_v57, %v628_v5 }
 0x6f4   :  { %634 = vadd.xlane.f32.xlu1 %v633_v60 }
 0x705   :  { %727 = vperm.xlu1 %786, %v998_v3  }
 0x77d   :  { %v635_v7 = vpop.xlane.xlu1 %634 }
 0x77e   :  { %v636_v10 = vmul.f32 0.001953125, %v635_v7 }
 0x780   :  { %v637_v61 = vsub.f32 %v557_v58, %v636_v10  ;;  %v638_v62 = vsub.f32 %v559_v59, %v636_v10 }
 0x781   :  { %v728_v23 = vpop.permute.xlu1 %727 }
 0x782   :  { %v639_v63 = vmul.f32 %v637_v61, %v637_v61  ;;  %v640_v4 = vmul.f32 %v638_v62, %v638_v62 }
 0x784   :  { %671 = vmatprep.subr.mxu0 %v640_v4 }
 0x785   :  { %672 = vmatpush1.msra.mxu0 %v639_v63 }
 0x786   :  { %760 = vmatmul.mubr.msk.f32.vlgmr.msra.gmra.mxu0 %vm245_vm9, %v1101_v24 }
 0x846   :  { %v707_v6 = vpop.f32.mrf.mxu0 }
 0x848   :  { %v709_v11 = vpop.f32.mrf.mxu0 }
 0x849   :  { %v712_v13 = vadd.f32 %v709_v11, %v707_v6 }
 0x84b   :  { %713 = vadd.xlane.f32.xlu0 %v712_v13 }
 0x8d4   :  { %v714_v15 = vpop.xlane.xlu0 %713 }
 0x8d5   :  { %v715_v17 = vmul.f32 0.001953125, %v714_v15 }
 0x8d7   :  { %v716_v18 = vadd.f32 1e-05, %v715_v17 }
 0x8d9   :  { %790 = vrsqrt.f32 %v716_v18 }
 0x8e6   :  { %v791_v19 = vpop.eup %790 }
 0x8e7   :  { %v718_v22 = vmul.f32 %v791_v19, %v998_v3 }
 0x8e9   :  { %721 = vperm.xlu0 %785, %v718_v22  }
 0x8ed   :  { %787 = vset.pattern.permute.xlu0 %v920_v14 }
 0x964   :  { %v722_v24 = vpop.permute.xlu0 %721 }
 0x965   :  { %v724_v25 = vmul.f32 %v722_v24, %v637_v61  ;;  %v725_v9 = vmul.f32 %v722_v24, %v638_v62 }
 0x967   :  { %v730_v8 = vadd.f32 %v728_v23, %v724_v25  ;;  %v731_v26 = vadd.f32 %v728_v23, %v725_v9 }
 0x969   :  { %v732_v27 = vadd.f32 %v730_v8, %v960_v0  ;;  %v733_v28 = vadd.f32 %v731_v26, %v966_v1 }
 0x96b   :  { %v734_v29 = vmax.f32 %v732_v27, 0.0  ;;  %v735_v16 = vmax.f32 %v733_v28, 0.0 }
 0x96d   :  { %736 = vst [vmem:[#allocation10] sm:$0xff] %v734_v29  ;;  %737 = vst [vmem:[#allocation10 + $0x8] sm:$0xff] %v735_v16 }
 0x96e   :  { %883 = shalt.err (!%p880_p10)
}
 0x96f   :  { %747 = dma.vmem_to_hbm [thread:$0]  %s745_s18, 256, %s1194_s4, [#allocation4]  }
 0x970   :  { %898 = dma.done.wait [#allocation4], 256  }
 0x971   :  { %899 = vsyncadd [#allocation4], 4294967040 }
 0x972   :  { %751 = vsyncpa [#allocation3], 1 }
 0x973   :  { %752 = vsyncpa [#allocation6], 1 }
 0x974   :  { %753 = vsyncpa [#allocation9], 1 }
 0x975   :  { %754 = vsyncpa [#allocation4], 1 }

</bundles_post_ra>
